<compile_context>
chip_gen: v7x
topology: tpu7x:2x2x1
jax: 0.10.0
libtpu: 0.0.40
codegen_flags: <defaults>
</compile_context>

<pallas_src>
import jax
import jax.numpy as jnp
from jax.experimental import pallas as pl
from jax.experimental.pallas import tpu as pltpu

F_PAD = 32        # per-layer packed width (sublane axis); layer widths <= F_PAD-1
IN_ROWS = 8       # padded input rows (sublane-aligned); in_features <= IN_ROWS-1
N_LAYERS = 4      # Linear(2,25), Linear(25,25), Linear(25,25), Linear(25,2)
LANE = 128        # TPU lane width
MAX_TILE_B = 8192 # batch-tile cap (well within scoped VMEM on v5e/v6e/v7x)


def _fused_mlp_kernel(x_ref, p_ref, o_ref):
    """Fused Sequential.forward for one batch tile.

    x_ref: [IN_ROWS, tile_b]  rows 0:in_f = x.T, row IN_ROWS-1 = 1 (bias row).
    p_ref: [F_PAD, N_LAYERS*F_PAD]  layer l packed at lanes l*F_PAD:(l+1)*F_PAD
           as [out, in] with bias folded into one column and a 1 preserving the
           ones row through every layer.
    o_ref: [8, tile_b]  rows 0:out_f hold tanh(final linear), rest zero.
    """
    # Layer 0: only the first IN_ROWS columns of its block are used.
    h = jnp.dot(p_ref[:, :IN_ROWS], x_ref[...],
                preferred_element_type=jnp.float32)          # [F_PAD, tile_b]
    h = jnp.maximum(h, 0.0)

    # Hidden layers 1..N_LAYERS-2: Linear + ReLU (bias folded into the matmul).
    for l in range(1, N_LAYERS - 1):
        w = p_ref[:, l * F_PAD:(l + 1) * F_PAD]
        h = jnp.maximum(jnp.dot(w, h, preferred_element_type=jnp.float32), 0.0)

    # Final Linear + Tanh.
    w = p_ref[:, (N_LAYERS - 1) * F_PAD:N_LAYERS * F_PAD]
    h = jnp.dot(w, h, preferred_element_type=jnp.float32)
    o_ref[...] = jnp.tanh(h[:o_ref.shape[0], :]).astype(o_ref.dtype)


def _pack_params(params):
    """Pack (w1,b1,...,w4,b4) into one lane-dense [F_PAD, N_LAYERS*F_PAD] slab.

    Weights come in as [in, out], biases as [1, out]. Layer l is stored at
    lanes [l*F_PAD, (l+1)*F_PAD) as [out, in] with the bias folded into column
    `bias_col` and a 1 at (F_PAD-1, bias_col) so the activations' constant
    ones-row survives every layer. Layer 0 uses bias_col = IN_ROWS-1 (its input
    slab is only IN_ROWS rows); later layers use bias_col = F_PAD-1.
    """
    ws = params[0::2]
    bs = params[1::2]
    slab = jnp.zeros((F_PAD, N_LAYERS * F_PAD), jnp.float32)
    for l, (w, b) in enumerate(zip(ws, bs)):
        in_f, out_f = w.shape
        if out_f > F_PAD - 1 or in_f > F_PAD - 1:
            raise ValueError(
                f"layer {l}: widths ({in_f},{out_f}) collide with the bias/ones "
                f"column; must be <= {F_PAD - 1}")
        if l == 0 and in_f > IN_ROWS - 1:
            raise ValueError(
                f"input features {in_f} must be <= {IN_ROWS - 1}")
        base = l * F_PAD
        bias_col = (IN_ROWS - 1) if l == 0 else (F_PAD - 1)
        slab = slab.at[:out_f, base:base + in_f].set(w.T.astype(jnp.float32))
        slab = slab.at[:out_f, base + bias_col].set(
            b.reshape(-1).astype(jnp.float32))
        slab = slab.at[F_PAD - 1, base + bias_col].set(1.0)
    return slab                                               # [32, 128]


def _pick_tile(b_aligned):
    """Batch-tile selection: one step for tiny batches, >=2 steps (v7x dual-TC)
    for larger batches, capped at MAX_TILE_B columns."""
    if b_aligned <= LANE:
        return b_aligned
    half = ((b_aligned // 2 + LANE - 1) // LANE) * LANE
    return min(half, MAX_TILE_B)


@jax.jit
def _forward_jit(x, *params):
    """Whole forward path fused into one executable: pack params, pad/transposed
    activations, pallas_call, slice + transpose back."""
    batch, in_f = x.shape
    out_f = params[-2].shape[1]

    p_slab = _pack_params(params)

    b_aligned = ((batch + LANE - 1) // LANE) * LANE
    tile_b = _pick_tile(b_aligned)
    b_pad = ((b_aligned + tile_b - 1) // tile_b) * tile_b

    # Transposed, padded activations: [IN_ROWS, b_pad], ones row at IN_ROWS-1.
    x_pad = jnp.zeros((IN_ROWS, b_pad), jnp.float32)
    x_pad = x_pad.at[:in_f, :batch].set(x.T.astype(jnp.float32))
    x_pad = x_pad.at[IN_ROWS - 1, :].set(1.0)

    grid = (b_pad // tile_b,)

    y_pad = pl.pallas_call(
        _fused_mlp_kernel,
        out_shape=jax.ShapeDtypeStruct((8, b_pad), jnp.float32),
        grid_spec=pltpu.PrefetchScalarGridSpec(
            num_scalar_prefetch=0,
            grid=grid,
            in_specs=[
                # activation tile: batch on lanes, only 8 sublanes of input DMA
                pl.BlockSpec((IN_ROWS, tile_b), lambda i: (0, i)),
                # single resident lane-dense parameter slab (constant index)
                pl.BlockSpec((F_PAD, N_LAYERS * F_PAD), lambda i: (0, 0)),
            ],
            out_specs=pl.BlockSpec((8, tile_b), lambda i: (0, i)),
        ),
        compiler_params=pltpu.CompilerParams(
            dimension_semantics=("parallel",)),
    )(x_pad, p_slab)

    # Back to the module's [batch, out_f] convention.
    return y_pad[:out_f, :batch].T


def sequential_forward(x, params):
    """Runs Sequential.forward(x): applies each layer of the model in order.

    x: [batch, in_features] float32
    params: tuple (w1, b1, w2, b2, w3, b3, w4, b4), weights [in, out],
            biases [1, out].
    """
    return _forward_jit(x, *params)


def _init_linear(key, fan_in, fan_out):
    """PyTorch-Linear-style uniform init: U(-1/sqrt(fan_in), 1/sqrt(fan_in))."""
    kw, kb = jax.random.split(key)
    bound = 1.0 / jnp.sqrt(jnp.float32(fan_in))
    w = jax.random.uniform(kw, (fan_in, fan_out), jnp.float32, -bound, bound)
    b = jax.random.uniform(kb, (1, fan_out), jnp.float32, -bound, bound)
    return w, b


def _reference_forward(x, params):
    """Pure-JAX reference of Sequential.forward for correctness checking."""
    w1, b1, w2, b2, w3, b3, w4, b4 = params
    h = jnp.maximum(x @ w1 + b1, 0.0)
    h = jnp.maximum(h @ w2 + b2, 0.0)
    h = jnp.maximum(h @ w3 + b3, 0.0)
    return jnp.tanh(h @ w4 + b4)


if __name__ == "__main__":
    key = jax.random.PRNGKey(0)
    k_x, k1, k2, k3, k4 = jax.random.split(key, 5)

    BATCH, IN_F, HID, OUT_F = 128, 2, 25, 2

    x = jax.random.normal(k_x, (BATCH, IN_F), jnp.float32)

    w1, b1 = _init_linear(k1, IN_F, HID)
    w2, b2 = _init_linear(k2, HID, HID)
    w3, b3 = _init_linear(k3, HID, HID)
    w4, b4 = _init_linear(k4, HID, OUT_F)
    params = (w1, b1, w2, b2, w3, b3, w4, b4)

    y = sequential_forward(x, params)
    y = jax.block_until_ready(y)

    y_ref = _reference_forward(x, params)
    assert y.shape == (BATCH, OUT_F)
    assert jnp.allclose(y, y_ref, atol=1e-5, rtol=1e-5), "mismatch vs reference"

    # TODO(synk): Sequential.backward (LossMSE + reversed layer backward passes)
    # is training-time logic and is not part of the forward kernel.

    print("KERNEL_OK")
</pallas_src>

<mosaic_0001>
module attributes {stable_mosaic.version = 11 : i64} {
  func.func @_fused_mlp_kernel(%arg0: i32, %arg1: memref<8x128xf32, #tpu.memory_space<vmem>>, %arg2: memref<32x128xf32, #tpu.memory_space<vmem>>, %arg3: memref<8x128xf32, #tpu.memory_space<vmem>>) attributes {dimension_semantics = [#tpu.dimension_semantics<parallel>], iteration_bounds = array<i64: 1>, scalar_prefetch = 0 : i64, scratch_operands = 0 : i64, tpu.core_type = #tpu.core_type<tc>, window_params = [{transform_indices = @transform_0, window_bounds = array<i64: 8, 128>}, {pipeline_mode = #tpu.pipeline_mode<synchronous>, transform_indices = @transform_1, window_bounds = array<i64: 32, 128>}, {transform_indices = @transform_2, window_bounds = array<i64: 8, 128>}]} {
    %c0 = arith.constant 0 : index
    %c0_0 = arith.constant 0 : index
    %0 = vector.load %arg2[%c0, %c0_0] : memref<32x128xf32, #tpu.memory_space<vmem>>, vector<32x8xf32>
    %c0_1 = arith.constant 0 : index
    %c0_2 = arith.constant 0 : index
    %1 = vector.load %arg1[%c0_1, %c0_2] : memref<8x128xf32, #tpu.memory_space<vmem>>, vector<8x128xf32>
    %cst = arith.constant dense<0.000000e+00> : vector<32x128xf32>
    %2 = tpu.matmul %0, %1, %cst {dimension_numbers = #tpu.dot_dimension_numbers<[1], [0], [0], [1], [0, 0, 1, 1], [], []>} : vector<32x8xf32>, vector<8x128xf32>, vector<32x128xf32> -> vector<32x128xf32>
    %cst_3 = arith.constant 0.000000e+00 : f32
    %3 = vector.broadcast %cst_3 : f32 to vector<32x128xf32>
    %4 = arith.maximumf %2, %3 : vector<32x128xf32>
    %c0_4 = arith.constant 0 : index
    %c32 = arith.constant 32 : index
    %5 = vector.load %arg2[%c0_4, %c32] : memref<32x128xf32, #tpu.memory_space<vmem>>, vector<32x32xf32>
    %cst_5 = arith.constant dense<0.000000e+00> : vector<32x128xf32>
    %6 = tpu.matmul %5, %4, %cst_5 {dimension_numbers = #tpu.dot_dimension_numbers<[1], [0], [0], [1], [0, 0, 1, 1], [], []>} : vector<32x32xf32>, vector<32x128xf32>, vector<32x128xf32> -> vector<32x128xf32>
    %cst_6 = arith.constant 0.000000e+00 : f32
    %7 = vector.broadcast %cst_6 : f32 to vector<32x128xf32>
    %8 = arith.maximumf %6, %7 : vector<32x128xf32>
    %c0_7 = arith.constant 0 : index
    %c64 = arith.constant 64 : index
    %9 = vector.load %arg2[%c0_7, %c64] : memref<32x128xf32, #tpu.memory_space<vmem>>, vector<32x32xf32>
    %cst_8 = arith.constant dense<0.000000e+00> : vector<32x128xf32>
    %10 = tpu.matmul %9, %8, %cst_8 {dimension_numbers = #tpu.dot_dimension_numbers<[1], [0], [0], [1], [0, 0, 1, 1], [], []>} : vector<32x32xf32>, vector<32x128xf32>, vector<32x128xf32> -> vector<32x128xf32>
    %cst_9 = arith.constant 0.000000e+00 : f32
    %11 = vector.broadcast %cst_9 : f32 to vector<32x128xf32>
    %12 = arith.maximumf %10, %11 : vector<32x128xf32>
    %c0_10 = arith.constant 0 : index
    %c96 = arith.constant 96 : index
    %13 = vector.load %arg2[%c0_10, %c96] : memref<32x128xf32, #tpu.memory_space<vmem>>, vector<32x32xf32>
    %cst_11 = arith.constant dense<0.000000e+00> : vector<32x128xf32>
    %14 = tpu.matmul %13, %12, %cst_11 {dimension_numbers = #tpu.dot_dimension_numbers<[1], [0], [0], [1], [0, 0, 1, 1], [], []>} : vector<32x32xf32>, vector<32x128xf32>, vector<32x128xf32> -> vector<32x128xf32>
    %15 = vector.extract_strided_slice %14 {offsets = [0, 0], sizes = [8, 128], strides = [1, 1]} : vector<32x128xf32> to vector<8x128xf32>
    %16 = math.tanh %15 : vector<8x128xf32>
    %c0_12 = arith.constant 0 : index
    %c0_13 = arith.constant 0 : index
    %17 = vector.load %arg3[%c0_12, %c0_13] : memref<8x128xf32, #tpu.memory_space<vmem>>, vector<8x128xf32>
    tpu.vector_store %arg3[%c0_12, %c0_13], %16 {strides = array<i32>} : memref<8x128xf32, #tpu.memory_space<vmem>>, vector<8x128xf32>,
    return
  }
  func.func @transform_0(%arg0: i32) -> (i32, i32) {
    %c0_i32 = arith.constant 0 : i32
    %c0_i32_0 = arith.constant 0 : i32
    return %c0_i32, %arg0 : i32, i32
  }
  func.func @transform_1(%arg0: i32) -> (i32, i32) {
    %c0_i32 = arith.constant 0 : i32
    %c0_i32_0 = arith.constant 0 : i32
    %c0_i32_1 = arith.constant 0 : i32
    return %c0_i32, %c0_i32_0 : i32, i32
  }
  func.func @transform_2(%arg0: i32) -> (i32, i32) {
    %c0_i32 = arith.constant 0 : i32
    %c0_i32_0 = arith.constant 0 : i32
    return %c0_i32, %arg0 : i32, i32
  }
}

</mosaic_0001>

<bundles_post_ra>
// kernel: _forward_jit.1
= control target key start
LH: loop header
LB: loop body
LE: loop exit
PB: predicated region body
PF: predicated region fallthrough
CT: control target
= control target key end

     0   :  { %vm16_vm0 = vcmask 64512   ;;  %s561_s17 = smov 96   ;;  %s562_s19 = smov 64   ;;  %vm126_vm1 = vcmask 261120   ;;  %s609_s0 = inlined_call_operand.vmem [shape: f32[8,128], index: 0, kind: input, shape index: {}]   ;;  %s610_s1 = inlined_call_operand.vmem [shape: f32[32,128], index: 1, kind: input, shape index: {}]   ;;  %s611_s2 = inlined_call_operand.vmem [shape: f32[8,128], index: 2, kind: output, shape index: {}]  }
   0x1   :  { %v15_v0 = vld [vmem:[%s609_s0] sm:$0xff]  ;;  %v12_v2 = vld [vmem:[%s610_s1 + $0x8] sm:$0xff]  ;;  %v13_v3 = vld [vmem:[%s610_s1 + $0x10] sm:$0xff] }
   0x2   :  { %v11_v1 = vld [vmem:[%s610_s1] sm:$0xff]  ;;  %478 = vmatprep.subr.mxu0 %v15_v0  ;;  %122 = vrot.lane.b32.xlu1 %v13_v3, %s561_s17  ;;  %v14_v4 = vld [vmem:[%s610_s1 + $0x18] sm:$0xff]  ;;  %s563_s1 = smov 32  }
   0x3   :  { %480 = vmatprep.mubr.msk.f32.mxu0 %vm16_vm0, %v11_v1  ;;  %479 = vmatpush3.msra.mxu0 %v15_v0 }
   0x4   :  { %118 = vrot.lane.b32.xlu0 %v11_v1, %s561_s17  ;;  %481 = vmatmul.mubr.msk.f32.vlgmr.msra.gmra.mrb[0].mxu0 %vm16_vm0, %v12_v2 }
   0x5   :  { %483 = vmatprep.mubr.msk.f32.mxu0 %vm16_vm0, %v13_v3 }
   0x6   :  { %124 = vrot.lane.b32.xlu1 %v14_v4, %s561_s17 }
   0x8   :  { %120 = vrot.lane.b32.xlu0 %v12_v2, %s561_s17  ;;  %484 = vmatmul.mubr.msk.f32.gmra.mrb[2].mxu0 %vm16_vm0, %v14_v4 }
   0xa   :  { %226 = vrot.lane.b32.xlu1 %v12_v2, %s562_s19 }
   0xc   :  { %224 = vrot.lane.b32.xlu0 %v11_v1, %s562_s19 }
   0xe   :  { %230 = vrot.lane.b32.xlu1 %v14_v4, %s562_s19 }
  0x10   :  { %228 = vrot.lane.b32.xlu0 %v13_v3, %s562_s19 }
  0x12   :  { %331 = vrot.lane.b32.xlu1 %v12_v2, %s563_s1 }
  0x14   :  { %329 = vrot.lane.b32.xlu0 %v11_v1, %s563_s1 }
  0x16   :  { %335 = vrot.lane.b32.xlu1 %v14_v4, %s563_s1 }
  0x18   :  { %333 = vrot.lane.b32.xlu0 %v13_v3, %s563_s1 }
  0x74   :  { %v123_v16 = vpop.permute.xlu1 %122 }
  0x76   :  { %v119_v5 = vpop.permute.xlu0 %118 }
  0x77   :  { %494 = vmatprep.mubr.msk.f32.mxu1 %vm126_vm1, %v119_v5 }
  0x78   :  { %v125_v18 = vpop.permute.xlu1 %124 }
  0x7a   :  { %v121_v17 = vpop.permute.xlu0 %120 }
  0x7c   :  { %v227_v30 = vpop.permute.xlu1 %226 }
  0x7e   :  { %v225_v19 = vpop.permute.xlu0 %224 }
  0x7f   :  { %508 = vmatprep.mubr.msk.f32.mxu0 %vm126_vm1, %v225_v19 }
  0x80   :  { %v231_v32 = vpop.permute.xlu1 %230 }
  0x82   :  { %v229_v31 = vpop.permute.xlu0 %228 }
  0x84   :  { %v332_v44 = vpop.permute.xlu1 %331 }
  0x86   :  { %v330_v33 = vpop.permute.xlu0 %329 }
  0x88   :  { %v336_v46 = vpop.permute.xlu1 %335 }
  0x8a   :  { %v334_v34 = vpop.permute.xlu0 %333 }
  0xd7   :  { %v482_v6 = vpop.f32.mrb[0].mxu0 }
  0xd8   :  { %v115_v7 = vmax.f32 %v482_v6, 0.0  ;;  %v95_v8 = vpop.f32.mrb[1].mxu0 }
  0xd9   :  { %v114_v9 = vmax.f32 %v95_v8, 0.0 }
  0xdb   :  { %v485_v10 = vpop.f32.mrb[2].mxu0  ;;  %v528_v11 = vpack.c.bf16 %v115_v7, %v114_v9 }
  0xdc   :  { %v117_v12 = vmax.f32 %v485_v10, 0.0  ;;  %v105_v13 = vpop.f32.mrb[3].mxu0 }
  0xdd   :  { %v116_v14 = vmax.f32 %v105_v13, 0.0  ;;  %529 = vmatprep.subr.bf16.mxu1 %v528_v11 }
  0xde   :  { %531 = vmatpush3.bf16.msra.mxu1 %v528_v11 }
  0xdf   :  { %v532_v15 = vpack.c.bf16 %v117_v12, %v116_v14 }
  0xe1   :  { %533 = vmatprep.subr.bf16.mxu1 %v532_v15 }
  0xe2   :  { %535 = vmatpush3.bf16.msra.mxu1 %v532_v15 }
  0xe5   :  { %495 = vmatmul.mubr.msk.f32.vlgmr.msra.gmra.mrb[0].mxu1 %vm126_vm1, %v121_v17 }
  0xe6   :  { %497 = vmatprep.mubr.msk.f32.mxu1 %vm126_vm1, %v123_v16 }
  0xe9   :  { %498 = vmatmul.mubr.msk.f32.gmra.mrb[2].mxu1 %vm126_vm1, %v125_v18 }
  0xea   :  { %525 = vmatprep.mubr.msk.f32.mxu1 %vm126_vm1, %v334_v34 }
 0x1b8   :  { %v496_v20 = vpop.f32.mrb[0].mxu1 }
 0x1b9   :  { %v221_v21 = vmax.f32 %v496_v20, 0.0  ;;  %v201_v22 = vpop.f32.mrb[1].mxu1 }
 0x1ba   :  { %v220_v23 = vmax.f32 %v201_v22, 0.0 }
 0x1bc   :  { %v536_v24 = vpack.c.bf16 %v221_v21, %v220_v23  ;;  %v499_v25 = vpop.f32.mrb[2].mxu1 }
 0x1bd   :  { %v223_v26 = vmax.f32 %v499_v25, 0.0  ;;  %v211_v27 = vpop.f32.mrb[3].mxu1 }
 0x1be   :  { %v222_v28 = vmax.f32 %v211_v27, 0.0  ;;  %537 = vmatprep.subr.bf16.mxu0 %v536_v24 }
 0x1bf   :  { %539 = vmatpush3.bf16.msra.mxu0 %v536_v24 }
 0x1c0   :  { %v540_v29 = vpack.c.bf16 %v223_v26, %v222_v28 }
 0x1c2   :  { %541 = vmatprep.subr.bf16.mxu0 %v540_v29 }
 0x1c3   :  { %543 = vmatpush3.bf16.msra.mxu0 %v540_v29 }
 0x1c6   :  { %509 = vmatmul.mubr.msk.f32.vlgmr.msra.gmra.mrb[4].mxu0 %vm126_vm1, %v227_v30 }
 0x1c7   :  { %511 = vmatprep.mubr.msk.f32.mxu0 %vm126_vm1, %v229_v31 }
 0x1ca   :  { %512 = vmatmul.mubr.msk.f32.gmra.mrb[6].mxu0 %vm126_vm1, %v231_v32 }
 0x1cb   :  { %522 = vmatprep.mubr.msk.f32.mxu0 %vm126_vm1, %v330_v33 }
 0x299   :  { %v510_v35 = vpop.f32.mrb[4].mxu0 }
 0x29a   :  { %v326_v36 = vmax.f32 %v510_v35, 0.0  ;;  %v306_v37 = vpop.f32.mrb[5].mxu0 }
 0x29b   :  { %v325_v38 = vmax.f32 %v306_v37, 0.0 }
 0x29d   :  { %v544_v39 = vpack.c.bf16 %v326_v36, %v325_v38  ;;  %v513_v40 = vpop.f32.mrb[6].mxu0 }
 0x29e   :  { %v328_v41 = vmax.f32 %v513_v40, 0.0  ;;  %v316_v42 = vpop.f32.mrb[7].mxu0 }
 0x29f   :  { %v327_v43 = vmax.f32 %v316_v42, 0.0  ;;  %545 = vmatprep.subr.bf16.mxu0 %v544_v39  ;;  %552 = vmatprep.subr.bf16.mxu1 %v544_v39 }
 0x2a0   :  { %547 = vmatpush3.bf16.msra.mxu0 %v544_v39  ;;  %554 = vmatpush3.bf16.msra.mxu1 %v544_v39 }
 0x2a1   :  { %v548_v45 = vpack.c.bf16 %v328_v41, %v327_v43 }
 0x2a3   :  { %549 = vmatprep.subr.bf16.mxu0 %v548_v45  ;;  %553 = vmatprep.subr.bf16.mxu1 %v548_v45 }
 0x2a4   :  { %551 = vmatpush3.bf16.msra.mxu0 %v548_v45  ;;  %555 = vmatpush3.bf16.msra.mxu1 %v548_v45 }
 0x2a7   :  { %523 = vmatmul.mubr.msk.f32.vlgmr.msra.gmra.mrb[8].mxu0 %vm126_vm1, %v332_v44  ;;  %526 = vmatmul.mubr.msk.f32.vlgmr.msra.gmra.mrb[4].mxu1 %vm126_vm1, %v336_v46 }
 0x37a   :  { %v524_v47 = vpop.f32.mrb[8].mxu0  ;;  %v527_v48 = vpop.f32.mrb[4].mxu1 }
 0x37b   :  { %v411_v49 = vpop.f32.mrb[9].mxu0  ;;  %v420_v50 = vpop.f32.mrb[5].mxu1 }
 0x37c   :  { %559 = vtanh.f32 %v411_v49 }
 0x386   :  { %v560_v51 = vpop.eup %559 }
 0x387   :  { %428 = vst [vmem:[%s611_s2] sm:$0xff] %v560_v51 }

</bundles_post_ra>
